<compile_context>
chip_gen: v5e
topology: v5e:2x2
jax: 0.10.0
libtpu: 0.0.40
codegen_flags: <defaults>
</compile_context>

<pallas_src>
import math

import jax
import jax.numpy as jnp
from jax import lax
from jax.experimental import pallas as pl
from jax.experimental.pallas import tpu as pltpu

SIGMA_V = 3.0                      # std-dev of the funnel "neck" coordinate
LOG_2PI = math.log(2.0 * math.pi)


def _round_up(n: int, m: int) -> int:
    return ((n + m - 1) // m) * m


def funnel_kernel(xt_ref, o_ref):
    # xt_ref: (D, bm) tile in VMEM  (dim on sublanes, batch on lanes).
    # o_ref : (1, bm) tile in VMEM  (batch on lanes -> lane-dense stores).
    xt = xt_ref[...].astype(jnp.float32)                      # (D, bm)
    d = xt.shape[0]
    d_rest = d - 1

    v = xt[0:1, :]                                            # (1, bm)

    # S = sum_{i>=1} x_i^2 : mask out row 0 (VPU select), reduce over
    # sublanes (XLU).  Keeps full f32 precision, no MXU involved.
    row = lax.broadcasted_iota(jnp.int32, xt.shape, 0)
    xm = jnp.where(row >= 1, xt, 0.0)
    s = jnp.sum(xm * xm, axis=0, keepdims=True)               # (1, bm)

    # log N(v | 0, 9) + sum_{i>=1} log N(x_i | 0, exp(v))
    const = (-0.5 * (LOG_2PI + 2.0 * math.log(SIGMA_V))
             - 0.5 * d_rest * LOG_2PI)
    logp = (const
            + (-0.5 / (SIGMA_V * SIGMA_V)) * (v * v)
            - 0.5 * d_rest * v
            - 0.5 * jnp.exp(-v) * s)

    o_ref[...] = logp.astype(o_ref.dtype)


def funnel_unnorm_log_prob(x, *, bm: int = 32768, min_grid_steps: int = 4):
    """Forward pass of Distribution (Neal's funnel unnormalized log prob).

    x: (batch, dim) array (float32 or bfloat16).  Returns float32 (batch,).
    """
    B, D = x.shape
    assert D >= 2, "funnel needs dim >= 2"

    # Batch-on-lanes layout: one upstream transpose, then all DMA is
    # lane-dense in the batch dimension (only sublanes pad D -> 16).
    xt = x.T                                                  # (D, B)

    # Tile selection: big enough to amortize the ~0.35us per-step pipeline
    # overhead, but capped so the grid has >= min_grid_steps steps where
    # possible (lets the "parallel" axis feed both v7x TensorCores).
    bm = max(128, _round_up(bm, 128))
    target = max(128, _round_up(pl.cdiv(B, min_grid_steps), 128))
    bm_eff = min(bm, target)
    grid = pl.cdiv(B, bm_eff)
    b_pad = grid * bm_eff
    if b_pad != B:
        # Padded columns are zeros -> finite log-probs, sliced off below.
        xt = jnp.pad(xt, ((0, 0), (0, b_pad - B)))

    d_pad = _round_up(D, 8)                                   # sublane padding
    out = pl.pallas_call(
        funnel_kernel,
        out_shape=jax.ShapeDtypeStruct((1, b_pad), jnp.float32),
        grid_spec=pltpu.PrefetchScalarGridSpec(
            num_scalar_prefetch=0,
            grid=(grid,),
            in_specs=[pl.BlockSpec((D, bm_eff), lambda i: (0, i))],
            out_specs=pl.BlockSpec((1, bm_eff), lambda i: (0, i)),
        ),
        compiler_params=pltpu.CompilerParams(
            dimension_semantics=("parallel",),
        ),
        cost_estimate=pl.CostEstimate(
            flops=B * (3 * D + 8),
            transcendentals=B,
            bytes_accessed=b_pad * d_pad * x.dtype.itemsize + b_pad * 4,
        ),
    )(xt)
    return out[0, :B]


def funnel_reference(x):
    """Pure-JAX reference (mirrors torch.distributions.Normal.log_prob math)."""
    v = x[:, 0]
    log_p_v = (-0.5 * v * v / (SIGMA_V ** 2)
               - 0.5 * (LOG_2PI + 2.0 * math.log(SIGMA_V)))
    rest = x[:, 1:]
    log_p_rest = jnp.sum(
        -0.5 * rest * rest * jnp.exp(-v)[:, None]
        - 0.5 * (v[:, None] + LOG_2PI),
        axis=-1,
    )
    return log_p_v + log_p_rest


if __name__ == "__main__":
    dim = 10

    # Small single-tile check (batch not a multiple of 128).
    x_small = jax.random.normal(jax.random.PRNGKey(0), (16, dim),
                                dtype=jnp.float32)
    out_small = jax.block_until_ready(funnel_unnorm_log_prob(x_small))
    ref_small = funnel_reference(x_small)
    assert out_small.shape == (16,)
    assert jnp.allclose(out_small, ref_small, atol=1e-3, rtol=1e-4), (
        out_small, ref_small)

    # Multi-step grid + batch padding check (2050 rows, capped tile -> 4 steps).
    x_big = 1.5 * jax.random.normal(jax.random.PRNGKey(1), (2050, dim),
                                    dtype=jnp.float32)
    out_big = jax.block_until_ready(funnel_unnorm_log_prob(x_big, bm=1024))
    ref_big = funnel_reference(x_big)
    assert out_big.shape == (2050,)
    assert jnp.allclose(out_big, ref_big, atol=1e-3, rtol=1e-4), (
        out_big, ref_big)

    print("KERNEL_OK")
</pallas_src>

<mosaic_0001>
module attributes {stable_mosaic.version = 11 : i64} {
  func.func @funnel_kernel(%arg0: i32, %arg1: memref<10x128xf32, #tpu.memory_space<vmem>>, %arg2: memref<1x128xf32, #tpu.memory_space<vmem>>) attributes {dimension_semantics = [#tpu.dimension_semantics<parallel>], iteration_bounds = array<i64: 1>, scalar_prefetch = 0 : i64, scratch_operands = 0 : i64, tpu.core_type = #tpu.core_type<tc>, window_params = [{transform_indices = @transform_0, window_bounds = array<i64: 10, 128>}, {transform_indices = @transform_1, window_bounds = array<i64: 1, 128>}]} {
    %c0 = arith.constant 0 : index
    %c0_0 = arith.constant 0 : index
    %0 = vector.load %arg1[%c0, %c0_0] : memref<10x128xf32, #tpu.memory_space<vmem>>, vector<10x128xf32>
    %1 = vector.extract_strided_slice %0 {offsets = [0, 0], sizes = [1, 128], strides = [1, 1]} : vector<10x128xf32> to vector<1x128xf32>
    %2 = tpu.iota {dimensions = array<i32: 0>} : vector<10x128xi32>
    %c1_i32 = arith.constant 1 : i32
    %3 = vector.broadcast %c1_i32 : i32 to vector<10x128xi32>
    %4 = arith.cmpi sge, %2, %3 : vector<10x128xi32>
    %cst = arith.constant 0.000000e+00 : f32
    %5 = vector.broadcast %cst : f32 to vector<10x128xf32>
    %6 = arith.select %4, %0, %5 : vector<10x128xi1>, vector<10x128xf32>
    %7 = arith.mulf %6, %6 : vector<10x128xf32>
    %cst_1 = arith.constant dense<0.000000e+00> : vector<128xf32>
    %8 = vector.multi_reduction <add>, %7, %cst_1 [0] : vector<10x128xf32> to vector<128xf32>
    %9 = vector.shape_cast %8 : vector<128xf32> to vector<1x128xf32>
    %10 = arith.mulf %1, %1 : vector<1x128xf32>
    %cst_2 = arith.constant -0.055555556 : f32
    %11 = vector.broadcast %cst_2 : f32 to vector<1x128xf32>
    %12 = arith.mulf %11, %10 : vector<1x128xf32>
    %cst_3 = arith.constant -10.2879972 : f32
    %13 = vector.broadcast %cst_3 : f32 to vector<1x128xf32>
    %14 = arith.addf %13, %12 : vector<1x128xf32>
    %cst_4 = arith.constant 4.500000e+00 : f32
    %15 = vector.broadcast %cst_4 : f32 to vector<1x128xf32>
    %16 = arith.mulf %15, %1 : vector<1x128xf32>
    %17 = arith.subf %14, %16 : vector<1x128xf32>
    %cst_5 = arith.constant 0.000000e+00 : f32
    %18 = vector.broadcast %cst_5 : f32 to vector<1x128xf32>
    %19 = arith.subf %18, %1 : vector<1x128xf32>
    %20 = math.exp %19 : vector<1x128xf32>
    %cst_6 = arith.constant 5.000000e-01 : f32
    %21 = vector.broadcast %cst_6 : f32 to vector<1x128xf32>
    %22 = arith.mulf %21, %20 : vector<1x128xf32>
    %23 = arith.mulf %22, %9 : vector<1x128xf32>
    %24 = arith.subf %17, %23 : vector<1x128xf32>
    %c0_7 = arith.constant 0 : index
    %c0_8 = arith.constant 0 : index
    %25 = vector.load %arg2[%c0_7, %c0_8] : memref<1x128xf32, #tpu.memory_space<vmem>>, vector<1x128xf32>
    tpu.vector_store %arg2[%c0_7, %c0_8], %24 {strides = array<i32>} : memref<1x128xf32, #tpu.memory_space<vmem>>, vector<1x128xf32>,
    return
  }
  func.func @transform_0(%arg0: i32) -> (i32, i32) {
    %c0_i32 = arith.constant 0 : i32
    %c0_i32_0 = arith.constant 0 : i32
    return %c0_i32, %arg0 : i32, i32
  }
  func.func @transform_1(%arg0: i32) -> (i32, i32) {
    %c0_i32 = arith.constant 0 : i32
    %c0_i32_0 = arith.constant 0 : i32
    return %c0_i32, %arg0 : i32, i32
  }
}

</mosaic_0001>

<bundles_post_ra>
// kernel: tpu_custom_call.1
= control target key start
LH: loop header
LB: loop body
LE: loop exit
PB: predicated region body
PF: predicated region fallthrough
CT: control target
= control target key end

     0   :  { %6 = vsyncpa [#allocation3], 0  ;;  %s152_s0 = inlined_call_operand.hbm [shape: f32[10,128], index: 0, kind: input, shape index: {}]   ;;  %s153_s1 = inlined_call_operand.hbm [shape: f32[1,128], index: 1, kind: output, shape index: {}]  }
   0x1   :  { %7 = vsyncpa [#allocation4], 0  ;;  %s12_s8 = sshll.u32 %s152_s0, 4  ;;  %s132_s9 = smov [#allocation2]   ;;  %s13_s8 = int_to_ptr.hbm [resolvable:$true] %s12_s8 }
   0x2   :  { %s14_s10 = sshll.u32 %s132_s9, 4  ;;  %s133_s11 = smov 128   ;;  %s15_s10 = int_to_ptr.vmem [resolvable:$true] %s14_s10 }
   0x3   :  { %s134_s12 = smov 8  }
   0x4   :  { %20 = dma.hbm_to_vmem [thread:$0]  %s13_s8, 256, %s15_s10, [#allocation3], %s133_s11, %s133_s11, %s134_s12  }
   0x5   :  { %128 = dma.done.wait [#allocation3], 256  }
   0x6   :  { %129 = vsyncadd [#allocation3], 4294967040  ;;  %v27_v0 = vlaneseq  ;;  %v25_v2 = vld [vmem:[#allocation2] sm:$0xff]  ;;  %v26_v3 = vld [vmem:[#allocation2 + $0x8] sm:$0x3]  ;;  %vm36_vm1 = vcmask 1041408  }
   0x7   :  { %v35_v5 = vmul.f32 %v26_v3, %v26_v3  ;;  %v50_v7 = vsub.f32 0.0, %v25_v2  ;;  %v45_v10 = vmul.f32 %v25_v2, %v25_v2  ;;  %v48_v19 = vmul.f32 4.5, %v25_v2  ;;  %s135_s0 = smov [#allocation5]   ;;  %s64_s16 = sshll.u32 %s153_s1, 4  ;;  %s65_s16 = int_to_ptr.hbm [resolvable:$true] %s64_s16 }
   0x8   :  { %v28_v1 = vshrl.u32 %v27_v0, 7  ;;  %s62_s13 = sshll.u32 %s135_s0, 4  ;;  %s63_s13 = int_to_ptr.vmem [resolvable:$true] %s62_s13 }
   0x9   :  { %v37_v8 = vsel %vm36_vm1, %v35_v5, 0.0  ;;  %v51_v11 = vmul.f32 1.442695, %v50_v7  ;;  %v46_v14 = vmul.f32 -0.055555556, %v45_v10 }
   0xa   :  { %vm30_vm0 = vcmp.ge.s32.totalorder %v28_v1, 1 }
   0xb   :  { %v32_v4 = vsel %vm30_vm0, %v25_v2, 0.0  ;;  %78 = vpow2.f32 %v51_v11  ;;  %v47_v18 = vadd.f32 -10.287997, %v46_v14 }
   0xc   :  { %v34_v6 = vmul.f32 %v32_v4, %v32_v4 }
   0xd   :  { %v49_v23 = vsub.f32 %v47_v18, %v48_v19 }
   0xe   :  { %v38_v9 = vadd.f32 %v37_v8, %v34_v6 }
  0x10   :  { %v39_v12 = vrot.slane %v38_v9, 4 }
  0x11   :  { %v79_v16 = vpop.eup %78 }
  0x12   :  { %v40_v13 = vadd.f32 %v39_v12, %v38_v9  ;;  %v53_v21 = vmul.f32 0.5, %v79_v16 }
  0x14   :  { %v41_v15 = vrot.slane %v40_v13, 2 }
  0x16   :  { %v42_v17 = vadd.f32 %v41_v15, %v40_v13 }
  0x18   :  { %v43_v20 = vrot.slane %v42_v17, 1 }
  0x1a   :  { %v44_v22 = vadd.f32 %v43_v20, %v42_v17 }
  0x1c   :  { %v54_v24 = vmul.f32 %v53_v21, %v44_v22 }
  0x1e   :  { %v55_v25 = vsub.f32 %v49_v23, %v54_v24 }
  0x20   :  { %56 = vst [vmem:[#allocation5] sm:$0x1] %v55_v25 }
  0x21   :  { %67 = dma.vmem_to_hbm [thread:$0]  %s63_s13, 16, %s65_s16, [#allocation4]  }
  0x22   :  { %130 = dma.done.wait [#allocation4], 16  }
  0x23   :  { %131 = vsyncadd [#allocation4], 4294967280 }
  0x24   :  { %72 = vsyncpa [#allocation3], 1 }
  0x25   :  { %73 = vsyncpa [#allocation4], 1 }

</bundles_post_ra>
